<compile_context>
chip_gen: v7x
topology: tpu7x:2x2x1
jax: 0.10.0
libtpu: 0.0.40
codegen_flags: <defaults>
</compile_context>

<pallas_src>
import functools

import jax
import jax.numpy as jnp
from jax.experimental import pallas as pl
from jax.experimental.pallas import tpu as pltpu


def _round_up(v, m):
    return (v + m - 1) // m * m


# ----------------------------- Pallas kernel --------------------------------


def gine_net_kernel(src_ref, dst_ref, x_ref, ea_ref, *rest, n_layers):
    """Fused GINE_Net forward (all conv layers) in one kernel.

    src_ref : (Ep, 1) int32 VMEM  edge source node (padded edges = -1)
    dst_ref : (1, Ep) int32 VMEM  edge destination node (padded edges = -1)
    x_ref   : (Np, F) bf16        node features (zero padded)
    ea_ref  : (Ep, F) bf16        edge features (zero padded)
    rest    : per-layer (w1 bf16, b1 f32, w2 bf16, b2 f32) with BN folded in,
              then o_ref (Np, O) f32, then scratch cur (Np, F) f32
    """
    params = [rest[4 * i:4 * i + 4] for i in range(n_layers)]
    o_ref = rest[4 * n_layers]
    cur_ref = rest[4 * n_layers + 1]

    ep = src_ref.shape[0]
    np_ = x_ref.shape[0]
    lo = x_ref.dtype  # bfloat16 (MXU operand dtype)

    # One-hot gather / scatter matrices, built ONCE in VMEM (the edge set is
    # shared by every layer).  Padded edges (src/dst == -1) match no node, so
    # they contribute nothing.  This keeps the MXU busy during propagate and
    # avoids the serialized per-edge RMW scatter entirely.
    g_iota = jax.lax.broadcasted_iota(jnp.int32, (ep, np_), 1)
    gather_oh = jnp.where(g_iota == src_ref[...], 1.0, 0.0).astype(lo)   # (Ep, Np)
    s_iota = jax.lax.broadcasted_iota(jnp.int32, (np_, ep), 0)
    scatter_oh = jnp.where(s_iota == dst_ref[...], 1.0, 0.0).astype(lo)  # (Np, Ep)

    ea = ea_ref[...].astype(jnp.float32)                                 # (Ep, F)

    for i, (w1_ref, b1_ref, w2_ref, b2_ref) in enumerate(params):
        if i == 0:
            feat_lo = x_ref[...]                       # bf16
            feat_hi = feat_lo.astype(jnp.float32)
        else:
            feat_hi = cur_ref[...]                     # f32 (full precision carry)
            feat_lo = feat_hi.astype(lo)

        # propagate: agg[i] = sum_{e: dst(e)==i} relu(feat[src(e)] + edge_attr[e])
        gathered = jnp.dot(gather_oh, feat_lo,
                           preferred_element_type=jnp.float32)           # (Ep, F) f32
        msg = jnp.maximum(gathered + ea, 0.0)                            # f32 VPU
        agg = jnp.dot(scatter_oh, msg.astype(lo),
                      preferred_element_type=jnp.float32)                # (Np, F) f32
        out = agg + feat_hi                            # eps == 0 -> (1+eps)*x == x

        # MLP with BatchNorm folded into the Linears: Lin1 -> ReLU -> Lin2
        h = jnp.dot(out.astype(lo), w1_ref[...],
                    preferred_element_type=jnp.float32) + b1_ref[...]
        h = jnp.maximum(h, 0.0)
        y = jnp.dot(h.astype(lo), w2_ref[...],
                    preferred_element_type=jnp.float32) + b2_ref[...]

        if i + 1 < n_layers:
            cur_ref[...] = jnp.maximum(y, 0.0)         # relu(dropout(x)), p == 0
        else:
            o_ref[...] = y                             # no relu after last conv


# ----------------------------- host-side prep -------------------------------


def _fold_bn_and_pad(layer, fpad, hpad, opad):
    """Fold inference BatchNorm into the Linears, zero-pad, cast weights bf16."""
    w1, b1, sc1, sh1, w2, b2, sc2, sh2 = layer
    w1f = w1 * sc1[None, :]
    b1f = b1 * sc1 + sh1
    w2f = w2 * sc2[None, :]
    b2f = b2 * sc2 + sh2
    w1p = jnp.pad(w1f, ((0, fpad - w1f.shape[0]),
                        (0, hpad - w1f.shape[1]))).astype(jnp.bfloat16)
    b1p = jnp.pad(b1f, (0, hpad - b1f.shape[0])).reshape(1, -1).astype(jnp.float32)
    w2p = jnp.pad(w2f, ((0, hpad - w2f.shape[0]),
                        (0, opad - w2f.shape[1]))).astype(jnp.bfloat16)
    b2p = jnp.pad(b2f, (0, opad - b2f.shape[0])).reshape(1, -1).astype(jnp.float32)
    return w1p, b1p, w2p, b2p


def gine_net_forward(x, edge_index, edge_attr, params):
    """GINE_Net.forward on a (x, edge_index, edge_attr) tuple — one fused kernel."""
    n, cin = x.shape
    e = edge_index.shape[1]
    n_layers = len(params)
    hid = params[0][0].shape[1]
    out_ch = params[-1][4].shape[1]
    if n_layers > 1:
        # edge_attr is reused at every layer (edge_dim=None) -> cin must equal hidden
        assert cin == hid, "GINEConv(edge_dim=None) reuse of edge_attr needs in_channels == hidden"
    assert edge_attr.shape[1] == cin

    # Lane width 128 is the hardware floor; NOTE: for production channel
    # counts < 128, batch several graphs along the node axis to amortize it.
    fpad = _round_up(max(cin, hid), 128)   # node / edge / hidden lane width
    hpad = fpad
    opad = _round_up(out_ch, 128)          # final output lane width
    np_ = _round_up(max(n, 16), 16)        # bf16 sublane multiple
    ep_ = _round_up(max(e, 128), 128)      # lane-dense dst row, bf16 sublanes

    x_p = jnp.pad(x.astype(jnp.float32),
                  ((0, np_ - n), (0, fpad - cin))).astype(jnp.bfloat16)
    ea_p = jnp.pad(edge_attr.astype(jnp.float32),
                   ((0, ep_ - e), (0, fpad - cin))).astype(jnp.bfloat16)
    src_p = jnp.pad(edge_index[0].astype(jnp.int32), (0, ep_ - e),
                    constant_values=-1).reshape(ep_, 1)
    dst_p = jnp.pad(edge_index[1].astype(jnp.int32), (0, ep_ - e),
                    constant_values=-1).reshape(1, ep_)

    flat_params = []
    for i, layer in enumerate(params):
        last = i + 1 == n_layers
        flat_params.extend(
            _fold_bn_and_pad(layer, fpad, hpad, opad if last else fpad))

    args = (src_p, dst_p, x_p, ea_p, *flat_params)
    vmem = pl.BlockSpec(memory_space=pltpu.MemorySpace.VMEM)
    in_specs = [vmem] * len(args)

    flops = 0
    for i in range(n_layers):
        ow = opad if i + 1 == n_layers else fpad
        flops += 2 * ep_ * np_ * fpad * 2     # gather + scatter one-hot matmuls
        flops += 2 * np_ * fpad * hpad        # Lin1
        flops += 2 * np_ * hpad * ow          # Lin2
    bytes_accessed = (sum(int(a.size) * a.dtype.itemsize for a in args)
                      + np_ * opad * 4)
    cost = pl.CostEstimate(flops=int(flops), transcendentals=0,
                           bytes_accessed=int(bytes_accessed))

    kernel = functools.partial(gine_net_kernel, n_layers=n_layers)
    out_p = pl.pallas_call(
        kernel,
        out_shape=jax.ShapeDtypeStruct((np_, opad), jnp.float32),
        in_specs=in_specs,
        out_specs=vmem,
        scratch_shapes=[
            pltpu.VMEM((np_, fpad), jnp.float32),   # cur (inter-layer node feats)
        ],
        compiler_params=pltpu.CompilerParams(vmem_limit_bytes=32 * 1024 * 1024),
        cost_estimate=cost,
    )(*args)
    return out_p[:n, :out_ch]


# ----------------------------- parameter setup ------------------------------


def _init_linear(key, fan_in, fan_out):
    """PyTorch-style Linear init (uniform +/- 1/sqrt(fan_in)). Weight stored (in, out)."""
    kw, kb = jax.random.split(key)
    lim = 1.0 / jnp.sqrt(float(fan_in))
    w = jax.random.uniform(kw, (fan_in, fan_out), jnp.float32, -lim, lim)
    b = jax.random.uniform(kb, (fan_out,), jnp.float32, -lim, lim)
    return w, b


def _init_bn_folded(key, c):
    """Inference-mode BatchNorm1d folded to (scale, shift).

    gamma/beta random (deterministic), running_mean=0, running_var=1, eps=1e-5.
    """
    kg, kb = jax.random.split(key)
    gamma = 1.0 + 0.1 * jax.random.normal(kg, (c,), jnp.float32)
    beta = 0.1 * jax.random.normal(kb, (c,), jnp.float32)
    mean = jnp.zeros((c,), jnp.float32)
    var = jnp.ones((c,), jnp.float32)
    scale = gamma / jnp.sqrt(var + 1e-5)
    shift = beta - mean * scale
    return scale, shift


def init_gine_net_params(key, in_channels, out_channels, hidden, max_depth):
    """One MLP([c_in, hidden, c_out_layer]) per conv layer."""
    params = []
    for i in range(max_depth):
        cin = in_channels if i == 0 else hidden
        cout = out_channels if i + 1 == max_depth else hidden
        key, k1, k2, k3, k4 = jax.random.split(key, 5)
        w1, b1 = _init_linear(k1, cin, hidden)
        sc1, sh1 = _init_bn_folded(k2, hidden)
        w2, b2 = _init_linear(k3, hidden, cout)
        sc2, sh2 = _init_bn_folded(k4, cout)
        params.append((w1, b1, sc1, sh1, w2, b2, sc2, sh2))
    return params


# ----------------------------- pure-JAX reference ---------------------------


def gine_net_reference(x, edge_index, edge_attr, params):
    """Unfused, unfolded f32 reference (BN as explicit scale/shift)."""
    src, dst = edge_index[0], edge_index[1]
    hp = jax.lax.Precision.HIGHEST
    h = x
    for i, (w1, b1, sc1, sh1, w2, b2, sc2, sh2) in enumerate(params):
        msg = jnp.maximum(h[src] + edge_attr, 0.0)
        agg = jnp.zeros_like(h).at[dst].add(msg)
        out = agg + h
        t = jnp.dot(out, w1, precision=hp) + b1
        t = t * sc1 + sh1
        t = jnp.maximum(t, 0.0)
        y = jnp.dot(t, w2, precision=hp) + b2
        y = y * sc2 + sh2
        h = jnp.maximum(y, 0.0) if i + 1 < len(params) else y
    return h


# --------------------------------- demo -------------------------------------


if __name__ == "__main__":
    # GINEConv with edge_dim=None requires edge_attr dim == node feature dim at
    # every layer, so in_channels == hidden.
    N = 16            # nodes
    E = 32            # edges
    IN_CH = 32        # in_channels
    HID = 32          # hidden
    OUT_CH = 16       # out_channels
    DEPTH = 2         # max_depth

    key = jax.random.PRNGKey(0)
    kx, ke, ks, kd, kp = jax.random.split(key, 5)

    x = jax.random.normal(kx, (N, IN_CH), jnp.float32)
    edge_attr = jax.random.normal(ke, (E, IN_CH), jnp.float32)
    src = jax.random.randint(ks, (E,), 0, N, dtype=jnp.int32)
    dst = jax.random.randint(kd, (E,), 0, N, dtype=jnp.int32)
    edge_index = jnp.stack([src, dst], axis=0)          # (2, E), PyG convention

    params = init_gine_net_params(kp, IN_CH, OUT_CH, HID, DEPTH)

    out = gine_net_forward(x, edge_index, edge_attr, params)
    out = jax.block_until_ready(out)
    assert out.shape == (N, OUT_CH), out.shape
    assert bool(jnp.all(jnp.isfinite(out))), "non-finite output"

    ref = jax.block_until_ready(gine_net_reference(x, edge_index, edge_attr, params))
    # Operands are streamed as bf16 (f32 accumulation), so allow bf16-level error.
    assert bool(jnp.allclose(out, ref, rtol=5e-2, atol=1e-1)), (
        "kernel/reference mismatch: max abs diff = %f"
        % float(jnp.max(jnp.abs(out - ref))))

    print("KERNEL_OK")
</pallas_src>

<mosaic_0001>
module attributes {stable_mosaic.version = 11 : i64} {
  func.func @gine_net_kernel(%arg0: memref<128x1xi32, #tpu.memory_space<vmem>>, %arg1: memref<1x128xi32, #tpu.memory_space<vmem>>, %arg2: memref<16x128xbf16, #tpu.memory_space<vmem>>, %arg3: memref<128x128xbf16, #tpu.memory_space<vmem>>, %arg4: memref<128x128xbf16, #tpu.memory_space<vmem>>, %arg5: memref<1x128xf32, #tpu.memory_space<vmem>>, %arg6: memref<128x128xbf16, #tpu.memory_space<vmem>>, %arg7: memref<1x128xf32, #tpu.memory_space<vmem>>, %arg8: memref<128x128xbf16, #tpu.memory_space<vmem>>, %arg9: memref<1x128xf32, #tpu.memory_space<vmem>>, %arg10: memref<128x128xbf16, #tpu.memory_space<vmem>>, %arg11: memref<1x128xf32, #tpu.memory_space<vmem>>, %arg12: memref<16x128xf32, #tpu.memory_space<vmem>>, %arg13: memref<16x128xf32, #tpu.memory_space<vmem>>) attributes {dimension_semantics = [], scalar_prefetch = 0 : i64, scratch_operands = 1 : i64, tpu.core_type = #tpu.core_type<tc>} {
    %0 = tpu.iota {dimensions = array<i32: 1>} : vector<128x16xi32>
    %c0 = arith.constant 0 : index
    %c0_0 = arith.constant 0 : index
    %1 = vector.load %arg0[%c0, %c0_0] : memref<128x1xi32, #tpu.memory_space<vmem>>, vector<128x1xi32>
    %2 = vector.broadcast %1 : vector<128x1xi32> to vector<128x16xi32>
    %3 = arith.cmpi eq, %0, %2 : vector<128x16xi32>
    %cst = arith.constant 1.000000e+00 : f32
    %cst_1 = arith.constant 0.000000e+00 : f32
    %4 = vector.broadcast %cst : f32 to vector<128x16xf32>
    %5 = vector.broadcast %cst_1 : f32 to vector<128x16xf32>
    %6 = arith.select %3, %4, %5 : vector<128x16xi1>, vector<128x16xf32>
    %7 = arith.truncf %6 : vector<128x16xf32> to vector<128x16xbf16>
    %8 = tpu.iota {dimensions = array<i32: 0>} : vector<16x128xi32>
    %c0_2 = arith.constant 0 : index
    %c0_3 = arith.constant 0 : index
    %9 = vector.load %arg1[%c0_2, %c0_3] : memref<1x128xi32, #tpu.memory_space<vmem>>, vector<1x128xi32>
    %10 = vector.broadcast %9 : vector<1x128xi32> to vector<16x128xi32>
    %11 = arith.cmpi eq, %8, %10 : vector<16x128xi32>
    %cst_4 = arith.constant 1.000000e+00 : f32
    %cst_5 = arith.constant 0.000000e+00 : f32
    %12 = vector.broadcast %cst_4 : f32 to vector<16x128xf32>
    %13 = vector.broadcast %cst_5 : f32 to vector<16x128xf32>
    %14 = arith.select %11, %12, %13 : vector<16x128xi1>, vector<16x128xf32>
    %15 = arith.truncf %14 : vector<16x128xf32> to vector<16x128xbf16>
    %c0_6 = arith.constant 0 : index
    %c0_7 = arith.constant 0 : index
    %16 = vector.load %arg3[%c0_6, %c0_7] : memref<128x128xbf16, #tpu.memory_space<vmem>>, vector<128x128xbf16>
    %17 = arith.extf %16 : vector<128x128xbf16> to vector<128x128xf32>
    %c0_8 = arith.constant 0 : index
    %c0_9 = arith.constant 0 : index
    %18 = vector.load %arg2[%c0_8, %c0_9] : memref<16x128xbf16, #tpu.memory_space<vmem>>, vector<16x128xbf16>
    %19 = arith.extf %18 : vector<16x128xbf16> to vector<16x128xf32>
    %cst_10 = arith.constant dense<0.000000e+00> : vector<128x128xf32>
    %20 = tpu.matmul %7, %18, %cst_10 {dimension_numbers = #tpu.dot_dimension_numbers<[1], [0], [0], [1], [0, 0, 1, 1], [], []>} : vector<128x16xbf16>, vector<16x128xbf16>, vector<128x128xf32> -> vector<128x128xf32>
    %21 = arith.addf %20, %17 : vector<128x128xf32>
    %cst_11 = arith.constant 0.000000e+00 : f32
    %22 = vector.broadcast %cst_11 : f32 to vector<128x128xf32>
    %23 = arith.maximumf %21, %22 : vector<128x128xf32>
    %24 = arith.truncf %23 : vector<128x128xf32> to vector<128x128xbf16>
    %cst_12 = arith.constant dense<0.000000e+00> : vector<16x128xf32>
    %25 = tpu.matmul %15, %24, %cst_12 {dimension_numbers = #tpu.dot_dimension_numbers<[1], [0], [0], [1], [0, 0, 1, 1], [], []>} : vector<16x128xbf16>, vector<128x128xbf16>, vector<16x128xf32> -> vector<16x128xf32>
    %26 = arith.addf %25, %19 : vector<16x128xf32>
    %27 = arith.truncf %26 : vector<16x128xf32> to vector<16x128xbf16>
    %c0_13 = arith.constant 0 : index
    %c0_14 = arith.constant 0 : index
    %28 = vector.load %arg4[%c0_13, %c0_14] : memref<128x128xbf16, #tpu.memory_space<vmem>>, vector<128x128xbf16>
    %cst_15 = arith.constant dense<0.000000e+00> : vector<16x128xf32>
    %29 = tpu.matmul %27, %28, %cst_15 {dimension_numbers = #tpu.dot_dimension_numbers<[1], [0], [0], [1], [0, 0, 1, 1], [], []>} : vector<16x128xbf16>, vector<128x128xbf16>, vector<16x128xf32> -> vector<16x128xf32>
    %c0_16 = arith.constant 0 : index
    %c0_17 = arith.constant 0 : index
    %30 = vector.load %arg5[%c0_16, %c0_17] : memref<1x128xf32, #tpu.memory_space<vmem>>, vector<1x128xf32>
    %31 = vector.broadcast %30 : vector<1x128xf32> to vector<16x128xf32>
    %32 = arith.addf %29, %31 : vector<16x128xf32>
    %cst_18 = arith.constant 0.000000e+00 : f32
    %33 = vector.broadcast %cst_18 : f32 to vector<16x128xf32>
    %34 = arith.maximumf %32, %33 : vector<16x128xf32>
    %35 = arith.truncf %34 : vector<16x128xf32> to vector<16x128xbf16>
    %c0_19 = arith.constant 0 : index
    %c0_20 = arith.constant 0 : index
    %36 = vector.load %arg6[%c0_19, %c0_20] : memref<128x128xbf16, #tpu.memory_space<vmem>>, vector<128x128xbf16>
    %cst_21 = arith.constant dense<0.000000e+00> : vector<16x128xf32>
    %37 = tpu.matmul %35, %36, %cst_21 {dimension_numbers = #tpu.dot_dimension_numbers<[1], [0], [0], [1], [0, 0, 1, 1], [], []>} : vector<16x128xbf16>, vector<128x128xbf16>, vector<16x128xf32> -> vector<16x128xf32>
    %c0_22 = arith.constant 0 : index
    %c0_23 = arith.constant 0 : index
    %38 = vector.load %arg7[%c0_22, %c0_23] : memref<1x128xf32, #tpu.memory_space<vmem>>, vector<1x128xf32>
    %39 = vector.broadcast %38 : vector<1x128xf32> to vector<16x128xf32>
    %40 = arith.addf %37, %39 : vector<16x128xf32>
    %cst_24 = arith.constant 0.000000e+00 : f32
    %41 = vector.broadcast %cst_24 : f32 to vector<16x128xf32>
    %42 = arith.maximumf %40, %41 : vector<16x128xf32>
    %c0_25 = arith.constant 0 : index
    %c0_26 = arith.constant 0 : index
    %43 = vector.load %arg13[%c0_25, %c0_26] : memref<16x128xf32, #tpu.memory_space<vmem>>, vector<16x128xf32>
    tpu.vector_store %arg13[%c0_25, %c0_26], %42 {strides = array<i32>} : memref<16x128xf32, #tpu.memory_space<vmem>>, vector<16x128xf32>,
    %c0_27 = arith.constant 0 : index
    %c0_28 = arith.constant 0 : index
    %44 = vector.load %arg13[%c0_27, %c0_28] : memref<16x128xf32, #tpu.memory_space<vmem>>, vector<16x128xf32>
    %45 = arith.truncf %44 : vector<16x128xf32> to vector<16x128xbf16>
    %cst_29 = arith.constant dense<0.000000e+00> : vector<128x128xf32>
    %46 = tpu.matmul %7, %45, %cst_29 {dimension_numbers = #tpu.dot_dimension_numbers<[1], [0], [0], [1], [0, 0, 1, 1], [], []>} : vector<128x16xbf16>, vector<16x128xbf16>, vector<128x128xf32> -> vector<128x128xf32>
    %47 = arith.addf %46, %17 : vector<128x128xf32>
    %cst_30 = arith.constant 0.000000e+00 : f32
    %48 = vector.broadcast %cst_30 : f32 to vector<128x128xf32>
    %49 = arith.maximumf %47, %48 : vector<128x128xf32>
    %50 = arith.truncf %49 : vector<128x128xf32> to vector<128x128xbf16>
    %cst_31 = arith.constant dense<0.000000e+00> : vector<16x128xf32>
    %51 = tpu.matmul %15, %50, %cst_31 {dimension_numbers = #tpu.dot_dimension_numbers<[1], [0], [0], [1], [0, 0, 1, 1], [], []>} : vector<16x128xbf16>, vector<128x128xbf16>, vector<16x128xf32> -> vector<16x128xf32>
    %52 = arith.addf %51, %44 : vector<16x128xf32>
    %53 = arith.truncf %52 : vector<16x128xf32> to vector<16x128xbf16>
    %c0_32 = arith.constant 0 : index
    %c0_33 = arith.constant 0 : index
    %54 = vector.load %arg8[%c0_32, %c0_33] : memref<128x128xbf16, #tpu.memory_space<vmem>>, vector<128x128xbf16>
    %cst_34 = arith.constant dense<0.000000e+00> : vector<16x128xf32>
    %55 = tpu.matmul %53, %54, %cst_34 {dimension_numbers = #tpu.dot_dimension_numbers<[1], [0], [0], [1], [0, 0, 1, 1], [], []>} : vector<16x128xbf16>, vector<128x128xbf16>, vector<16x128xf32> -> vector<16x128xf32>
    %c0_35 = arith.constant 0 : index
    %c0_36 = arith.constant 0 : index
    %56 = vector.load %arg9[%c0_35, %c0_36] : memref<1x128xf32, #tpu.memory_space<vmem>>, vector<1x128xf32>
    %57 = vector.broadcast %56 : vector<1x128xf32> to vector<16x128xf32>
    %58 = arith.addf %55, %57 : vector<16x128xf32>
    %cst_37 = arith.constant 0.000000e+00 : f32
    %59 = vector.broadcast %cst_37 : f32 to vector<16x128xf32>
    %60 = arith.maximumf %58, %59 : vector<16x128xf32>
    %61 = arith.truncf %60 : vector<16x128xf32> to vector<16x128xbf16>
    %c0_38 = arith.constant 0 : index
    %c0_39 = arith.constant 0 : index
    %62 = vector.load %arg10[%c0_38, %c0_39] : memref<128x128xbf16, #tpu.memory_space<vmem>>, vector<128x128xbf16>
    %cst_40 = arith.constant dense<0.000000e+00> : vector<16x128xf32>
    %63 = tpu.matmul %61, %62, %cst_40 {dimension_numbers = #tpu.dot_dimension_numbers<[1], [0], [0], [1], [0, 0, 1, 1], [], []>} : vector<16x128xbf16>, vector<128x128xbf16>, vector<16x128xf32> -> vector<16x128xf32>
    %c0_41 = arith.constant 0 : index
    %c0_42 = arith.constant 0 : index
    %64 = vector.load %arg11[%c0_41, %c0_42] : memref<1x128xf32, #tpu.memory_space<vmem>>, vector<1x128xf32>
    %65 = vector.broadcast %64 : vector<1x128xf32> to vector<16x128xf32>
    %66 = arith.addf %63, %65 : vector<16x128xf32>
    %c0_43 = arith.constant 0 : index
    %c0_44 = arith.constant 0 : index
    %67 = vector.load %arg12[%c0_43, %c0_44] : memref<16x128xf32, #tpu.memory_space<vmem>>, vector<16x128xf32>
    tpu.vector_store %arg12[%c0_43, %c0_44], %66 {strides = array<i32>} : memref<16x128xf32, #tpu.memory_space<vmem>>, vector<16x128xf32>,
    return
  }
}

</mosaic_0001>

<bundles_post_ra>
// kernel: tpu_custom_call.1
= control target key start
LH: loop header
LB: loop body
LE: loop exit
PB: predicated region body
PF: predicated region fallthrough
CT: control target
= control target key end

     0   :  { %17 = vsyncpa [#allocation4], 0  ;;  %s2110_s0 = inlined_call_operand.vmem [shape: s32[128,1], index: 0, kind: input, shape index: {}]   ;;  %s2111_s1 = inlined_call_operand.hbm [shape: s32[1,128], index: 1, kind: input, shape index: {}]   ;;  %s2112_s2 = inlined_call_operand.vmem [shape: bf16[16,128], index: 2, kind: input, shape index: {}]   ;;  %s2113_s3 = inlined_call_operand.vmem [shape: bf16[128,128], index: 3, kind: input, shape index: {}]   ;;  %s2114_s4 = inlined_call_operand.vmem [shape: bf16[128,128], index: 4, kind: input, shape index: {}]   ;;  %s2115_s5 = inlined_call_operand.vmem [shape: f32[1,128], index: 5, kind: input, shape index: {}]   ;;  %s2116_s6 = inlined_call_operand.hbm [shape: bf16[128,128], index: 6, kind: input, shape index: {}]   ;;  %s2117_s7 = inlined_call_operand.vmem [shape: f32[1,128], index: 7, kind: input, shape index: {}]   ;;  %s2118_s8 = inlined_call_operand.hbm [shape: bf16[128,128], index: 8, kind: input, shape index: {}]   ;;  %s2119_s9 = inlined_call_operand.vmem [shape: f32[1,128], index: 9, kind: input, shape index: {}]   ;;  %s2120_s10 = inlined_call_operand.hbm [shape: bf16[128,128], index: 10, kind: input, shape index: {}]   ;;  %s2121_s11 = inlined_call_operand.vmem [shape: f32[1,128], index: 11, kind: input, shape index: {}]   ;;  %s2122_s12 = inlined_call_operand.hbm [shape: f32[16,128], index: 12, kind: output, shape index: {}]  }
   0x1   :  { %18 = vsyncpa [#allocation7], 0 }
   0x2   :  { %19 = vsyncpa [#allocation10], 0 }
   0x3   :  { %20 = vsyncpa [#allocation5], 0  ;;  %s1582_s21 = smov [#allocation6]   ;;  %s1464_s25 = scalar_lea.hbm %s2116_s6, 1024 }
   0x4   :  { %s46_s22 = sshll.u32 %s1582_s21, 4  ;;  %p1465_p0 = scmp.ne.s32.totalorder %s2116_s6, %s1464_s25  ;;  %s47_s22 = int_to_ptr.vmem [resolvable:$true] %s46_s22 }
   0x5   :  { %p1468_p1 = scmp.lt.u32.totalorder %s1464_s25, %s2116_s6 }
   0x7   :  { %p1470_p2 = pnand %p1468_p1, %p1465_p0 }
   0x9   :  { %1473 = shalt.err (!%p1470_p2)
}
   0xa   :  { %s1474_s30 = scalar_lea.vmem %s47_s22, 1024  ;;  %p1479_p4 = scmp.lt.s32.totalorder %s47_s22, %s47_s22 }
   0xb   :  { %p1475_p3 = scmp.ne.s32.totalorder %s47_s22, %s1474_s30  ;;  %p1480_p5 = scmp.lt.s32.totalorder %s1474_s30, %s1474_s30 }
   0xd   :  { %p1481_p6 = por %p1480_p5, %p1479_p4 }
   0xf   :  { %p1482_p7 = pnand %p1481_p6, %p1475_p3 }
  0x11   :  { %1485 = shalt.err (!%p1482_p7)
}
  0x12   :  { %s1583_s13 = smov 64   ;;  %s1584_s14 = smov 4  }
  0x13   :  { %52 = dma.hbm_to_vmem [thread:$0]  %s2116_s6, 1024, %s47_s22, [#allocation7], %s1583_s13, %s1583_s13, %s1584_s14  }
  0x14   :  { %s1585_s17 = smov [#allocation3]   ;;  %s1586_s19 = smov [#allocation8]  }
  0x15   :  { %s29_s18 = sshll.u32 %s1585_s17, 4  ;;  %s60_s20 = sshll.u32 %s1586_s19, 4  ;;  %s30_s18 = int_to_ptr.vmem [resolvable:$true] %s29_s18  ;;  %s61_s20 = int_to_ptr.vmem [resolvable:$true] %s60_s20 }
  0x16   :  { %s1486_s24 = scalar_lea.hbm %s2111_s1, 16 }
  0x17   :  { %p1487_p8 = scmp.ne.s32.totalorder %s2111_s1, %s1486_s24  ;;  %p1490_p9 = scmp.lt.u32.totalorder %s1486_s24, %s2111_s1 }
  0x19   :  { %p1492_p10 = pnand %p1490_p9, %p1487_p8 }
  0x1b   :  { %1495 = shalt.err (!%p1492_p10)
}
  0x1c   :  { %s1496_s6 = scalar_lea.vmem %s30_s18, 16  ;;  %s1500_s22 = scalar_lea.vmem %s30_s18, 32 }
  0x1d   :  { %p1497_p11 = scmp.ne.s32.totalorder %s30_s18, %s1496_s6  ;;  %p1501_p12 = scmp.lt.s32.totalorder %s30_s18, %s30_s18 }
  0x1e   :  { %p1502_p13 = scmp.lt.s32.totalorder %s1500_s22, %s1496_s6 }
  0x20   :  { %p1503_p0 = por %p1502_p13, %p1501_p12 }
  0x22   :  { %p1504_p1 = pnand %p1503_p0, %p1497_p11 }
  0x24   :  { %1507 = shalt.err (!%p1504_p1)
}
  0x25   :  { %32 = dma.hbm_to_vmem [thread:$0]  %s2111_s1, 16, %s30_s18, [#allocation4]  }
  0x26   :  { %s1508_s17 = scalar_lea.hbm %s2118_s8, 1024 }
  0x27   :  { %p1509_p2 = scmp.ne.s32.totalorder %s2118_s8, %s1508_s17  ;;  %p1512_p3 = scmp.lt.u32.totalorder %s1508_s17, %s2118_s8 }
  0x29   :  { %p1514_p4 = pnand %p1512_p3, %p1509_p2 }
  0x2b   :  { %1517 = shalt.err (!%p1514_p4)
}
  0x2c   :  { %s1518_s25 = scalar_lea.vmem %s61_s20, 1024  ;;  %p1523_p6 = scmp.lt.s32.totalorder %s61_s20, %s61_s20 }
  0x2d   :  { %p1519_p5 = scmp.ne.s32.totalorder %s61_s20, %s1518_s25  ;;  %p1524_p7 = scmp.lt.s32.totalorder %s1518_s25, %s1518_s25 }
  0x2f   :  { %p1525_p8 = por %p1524_p7, %p1523_p6 }
  0x31   :  { %p1526_p9 = pnand %p1525_p8, %p1519_p5 }
  0x33   :  { %1529 = shalt.err (!%p1526_p9)
}
  0x34   :  { %66 = dma.hbm_to_vmem [thread:$0]  %s2118_s8, 1024, %s61_s20, [#allocation7], %s1583_s13, %s1583_s13, %s1584_s14  }
  0x35   :  { %s1587_s26 = smov [#allocation9]   ;;  %s1530_s22 = scalar_lea.hbm %s2120_s10, 1024 }
  0x36   :  { %s74_s27 = sshll.u32 %s1587_s26, 4  ;;  %p1531_p10 = scmp.ne.s32.totalorder %s2120_s10, %s1530_s22  ;;  %s75_s27 = int_to_ptr.vmem [resolvable:$true] %s74_s27 }
  0x37   :  { %p1534_p11 = scmp.lt.u32.totalorder %s1530_s22, %s2120_s10 }
  0x39   :  { %p1536_p12 = pnand %p1534_p11, %p1531_p10 }
  0x3b   :  { %1539 = shalt.err (!%p1536_p12)
}
  0x3c   :  { %s1540_s17 = scalar_lea.vmem %s75_s27, 1024  ;;  %p1545_p0 = scmp.lt.s32.totalorder %s75_s27, %s75_s27 }
  0x3d   :  { %p1541_p13 = scmp.ne.s32.totalorder %s75_s27, %s1540_s17  ;;  %p1546_p1 = scmp.lt.s32.totalorder %s1540_s17, %s1540_s17 }
  0x3f   :  { %p1547_p2 = por %p1546_p1, %p1545_p0 }
  0x41   :  { %p1548_p3 = pnand %p1547_p2, %p1541_p13 }
  0x43   :  { %1551 = shalt.err (!%p1548_p3)
}
  0x44   :  { %80 = dma.hbm_to_vmem [thread:$0]  %s2120_s10, 1024, %s75_s27, [#allocation10], %s1583_s13, %s1583_s13, %s1584_s14  }
  0x45   :  { %1574 = dma.done.wait [#allocation4], 16  }
  0x46   :  { %1575 = vsyncadd [#allocation4], 4294967280 }
  0x47   :  { %1576 = dma.done.wait [#allocation7], 2048  }
  0x48   :  { %1577 = vsyncadd [#allocation7], 4294965248 }
  0x49   :  { %1578 = dma.done.wait [#allocation10], 1024  }
  0x4a   :  { %1579 = vsyncadd [#allocation10], 4294966272  ;;  %v1588_v0 = vmov 0   ;;  %v1589_v1 = vmov 0.0   ;;  %v100_v2 = vld [vmem:[%s2110_s0 + $0x10] sm:$0xff]  ;;  %v98_v3 = vld [vmem:[%s2110_s0] sm:$0xff]  ;;  %v96_v19 = vlaneseq }
  0x4b   :  { %1429 = vset.pattern.permute.xlu1 %v1588_v0  ;;  %1428 = vset.pattern.permute.xlu0 %v1588_v0  ;;  %v101_v4 = vld [vmem:[%s2110_s0 + $0x18] sm:$0xff]  ;;  %v99_v5 = vld [vmem:[%s2110_s0 + $0x8] sm:$0xff]  ;;  %v102_v7 = vld [vmem:[%s2110_s0 + $0x20] sm:$0xff]  ;;  %vm257_vm4 = vcmask 130048   ;;  %s1592_s20 = smov [#allocation11]  }
  0x4c   :  { %1297 = vmatprep.subr.bf16.mxu0 %v1589_v1  ;;  %121 = vperm.xlu1 %1429, %v100_v2   ;;  %v103_v6 = vld [vmem:[%s2110_s0 + $0x28] sm:$0xff]  ;;  %v1739_v8 = vld [vmem:[%s2112_s2] sm:$0xff]   ;;  %v105_v9 = vld [vmem:[%s2110_s0 + $0x38] sm:$0xff]  ;;  %v1775_v20 = vand.u32 127, %v96_v19  ;;  %s1076_s19 = sshll.u32 %s1592_s20, 4  ;;  %s1077_s19 = int_to_ptr.vmem [resolvable:$true] %s1076_s19 }
  0x4d   :  { %115 = vperm.xlu0 %1428, %v98_v3   ;;  %v104_v10 = vld [vmem:[%s2110_s0 + $0x30] sm:$0xff]  ;;  %1259 = vmatprep.subr.bf16.mxu1 %v1739_v8  ;;  %v107_v11 = vld [vmem:[%s2110_s0 + $0x48] sm:$0xff]  ;;  %v106_v12 = vld [vmem:[%s2110_s0 + $0x40] sm:$0xff]  ;;  %p1557_p5 = scmp.lt.s32.totalorder %s1077_s19, %s1077_s19 }
  0x4e   :  { %1260 = vmatpush3.bf16.msra.mxu1 %v1739_v8  ;;  %v109_v13 = vld [vmem:[%s2110_s0 + $0x58] sm:$0xff]  ;;  %v108_v14 = vld [vmem:[%s2110_s0 + $0x50] sm:$0xff]  ;;  %v111_v15 = vld [vmem:[%s2110_s0 + $0x68] sm:$0xff] }
  0x4f   :  { %1277 = vmatprep.subr.bf16.mxu1 %v1589_v1  ;;  %v110_v16 = vld [vmem:[%s2110_s0 + $0x60] sm:$0xff]  ;;  %v113_v17 = vld [vmem:[%s2110_s0 + $0x78] sm:$0xff]  ;;  %v112_v18 = vld [vmem:[%s2110_s0 + $0x70] sm:$0xff] }
  0x50   :  { %124 = vperm.xlu1 %1429, %v101_v4   ;;  %v1431_v61 = vld [vmem:[%s2114_s4] sm:$0xff]   ;;  %v1432_v62 = vld [vmem:[%s2114_s4 + $0x8] sm:$0xff]   ;;  %v1433_v63 = vld [vmem:[%s2114_s4 + $0x10] sm:$0xff]  }
  0x51   :  { %118 = vperm.xlu0 %1428, %v99_v5   ;;  %1298 = vmatpush3.bf16.msra.mxu0 %v1431_v61  ;;  %v1434_v0 = vld [vmem:[%s2114_s4 + $0x18] sm:$0xff]   ;;  %v1435_v2 = vld [vmem:[%s2114_s4 + $0x20] sm:$0xff]   ;;  %v1436_v3 = vld [vmem:[%s2114_s4 + $0x28] sm:$0xff]  }
  0x52   :  { %1299 = vmatprep.subr.bf16.mxu0 %v1589_v1  ;;  %v1872_v4 = vld [vmem:[%s2113_s3 + $0x8] sm:$0xff]   ;;  %v1877_v5 = vld [vmem:[%s2113_s3] sm:$0xff]  }
  0x54   :  { %130 = vperm.xlu1 %1429, %v103_v6   ;;  %v1154_v6 = vunpack.c.l.bf16 %v1872_v4 }
  0x55   :  { %127 = vperm.xlu0 %1428, %v102_v7   ;;  %1300 = vmatpush3.bf16.msra.mxu0 %v1432_v62  ;;  %v1150_v7 = vunpack.c.l.bf16 %v1877_v5 }
  0x56   :  { %1301 = vmatprep.subr.bf16.mxu0 %v1589_v1 }
  0x58   :  { %136 = vperm.xlu1 %1429, %v105_v9   ;;  %v1155_v9 = vunpack.c.h.bf16 %v1872_v4 }
  0x59   :  { %133 = vperm.xlu0 %1428, %v104_v10   ;;  %1302 = vmatpush3.bf16.msra.mxu0 %v1433_v63 }
  0x5a   :  { %1303 = vmatprep.subr.bf16.mxu0 %v1589_v1 }
  0x5c   :  { %142 = vperm.xlu1 %1429, %v107_v11   ;;  %v1151_v11 = vunpack.c.h.bf16 %v1877_v5 }
  0x5d   :  { %139 = vperm.xlu0 %1428, %v106_v12   ;;  %1304 = vmatpush3.bf16.msra.mxu0 %v1434_v0 }
  0x5e   :  { %1305 = vmatprep.subr.bf16.mxu0 %v1589_v1 }
  0x60   :  { %148 = vperm.xlu1 %1429, %v109_v13  }
  0x61   :  { %145 = vperm.xlu0 %1428, %v108_v14   ;;  %1306 = vmatpush3.bf16.msra.mxu0 %v1435_v2  ;;  %v1936_v2 = vld [vmem:[%s2113_s3 + $0x38] sm:$0xff]  }
  0x62   :  { %1307 = vmatprep.subr.bf16.mxu0 %v1589_v1 }
  0x64   :  { %154 = vperm.xlu1 %1429, %v111_v15  }
  0x65   :  { %151 = vperm.xlu0 %1428, %v110_v16   ;;  %1308 = vmatpush3.bf16.msra.mxu0 %v1436_v3  ;;  %v1890_v16 = vld [vmem:[%s2113_s3 + $0x18] sm:$0xff]  }
  0x66   :  { %1309 = vmatprep.subr.bf16.mxu0 %v1589_v1 }
  0x68   :  { %160 = vperm.xlu1 %1429, %v113_v17  }
  0x69   :  { %157 = vperm.xlu0 %1428, %v112_v18  }
  0xcb   :  { %v122_v21 = vpop.permute.xlu1 %121 }
  0xcc   :  { %v116_v22 = vpop.permute.xlu0 %115  ;;  %vm164_vm0 = vcmp.eq.s32.totalorder %v1775_v20, %v122_v21 }
  0xcd   :  { %vm162_vm1 = vcmp.eq.s32.totalorder %v1775_v20, %v116_v22  ;;  %v180_v25 = vsel %vm164_vm0, 1.0, %v1589_v1 }
  0xce   :  { %v178_v26 = vsel %vm162_vm1, 1.0, %v1589_v1  ;;  %vm1590_vm1 = vmmov 0  }
  0xcf   :  { %v125_v23 = vpop.permute.xlu1 %124  ;;  %1313 = vmatprep.mubr.msk.bf16.mxu0 %vm1590_vm1, %v1589_v1 }
  0xd0   :  { %v119_v24 = vpop.permute.xlu0 %118  ;;  %vm165_vm2 = vcmp.eq.s32.totalorder %v1775_v20, %v125_v23 }
  0xd1   :  { %vm163_vm3 = vcmp.eq.s32.totalorder %v1775_v20, %v119_v24  ;;  %v181_v27 = vsel %vm165_vm2, 1.0, %v1589_v1  ;;  %v1162_v24 = vunpack.c.l.bf16 %v1890_v16 }
  0xd2   :  { %v179_v28 = vsel %vm163_vm3, 1.0, %v1589_v1  ;;  %v1785_v29 = vpack.c.bf16 %v181_v27, %v180_v25 }
  0xd3   :  { %v1787_v30 = vpack.c.bf16 %v179_v28, %v178_v26  ;;  %v131_v31 = vpop.permute.xlu1 %130 }
  0xd4   :  { %v128_v32 = vpop.permute.xlu0 %127  ;;  %vm167_vm5 = vcmp.eq.s32.totalorder %v1775_v20, %v131_v31  ;;  %v1163_v31 = vunpack.c.h.bf16 %v1890_v16 }
  0xd5   :  { %vm166_vm6 = vcmp.eq.s32.totalorder %v1775_v20, %v128_v32  ;;  %1261 = vmatprep.mubr.msk.bf16.mxu1 %vm257_vm4, %v1787_v30  ;;  %v183_v33 = vsel %vm167_vm5, 1.0, %v1589_v1 }
  0xd6   :  { %v182_v34 = vsel %vm166_vm6, 1.0, %v1589_v1  ;;  %1262 = vmatmul.mubr.msk.bf16.vlgmr.msra.gmra.mrb[0].mxu1 %vm257_vm4, %v1785_v29 }
  0xd7   :  { %v1797_v35 = vpack.c.bf16 %v183_v33, %v182_v34  ;;  %v137_v36 = vpop.permute.xlu1 %136 }
  0xd8   :  { %v134_v37 = vpop.permute.xlu0 %133  ;;  %vm169_vm7 = vcmp.eq.s32.totalorder %v1775_v20, %v137_v36 }
  0xd9   :  { %vm168_vm8 = vcmp.eq.s32.totalorder %v1775_v20, %v134_v37  ;;  %1265 = vmatprep.mubr.msk.bf16.mxu1 %vm257_vm4, %v1797_v35  ;;  %v185_v38 = vsel %vm169_vm7, 1.0, %v1589_v1 }
  0xda   :  { %v184_v39 = vsel %vm168_vm8, 1.0, %v1589_v1 }
  0xdb   :  { %v1805_v40 = vpack.c.bf16 %v185_v38, %v184_v39  ;;  %v143_v41 = vpop.permute.xlu1 %142 }
  0xdc   :  { %v140_v42 = vpop.permute.xlu0 %139  ;;  %vm171_vm9 = vcmp.eq.s32.totalorder %v1775_v20, %v143_v41  ;;  %v1912_v41 = vld [vmem:[%s2113_s3 + $0x28] sm:$0xff]  }
  0xdd   :  { %vm170_vm10 = vcmp.eq.s32.totalorder %v1775_v20, %v140_v42  ;;  %v187_v43 = vsel %vm171_vm9, 1.0, %v1589_v1 }
  0xde   :  { %v186_v44 = vsel %vm170_vm10, 1.0, %v1589_v1  ;;  %1266 = vmatmul.mubr.msk.bf16.gmra.mrb[4].mxu1 %vm257_vm4, %v1805_v40 }
  0xdf   :  { %v1813_v45 = vpack.c.bf16 %v187_v43, %v186_v44  ;;  %v149_v46 = vpop.permute.xlu1 %148  ;;  %v1920_v44 = vld [vmem:[%s2113_s3 + $0x20] sm:$0xff]  }
  0xe0   :  { %v146_v47 = vpop.permute.xlu0 %145  ;;  %vm173_vm11 = vcmp.eq.s32.totalorder %v1775_v20, %v149_v46 }
  0xe1   :  { %vm172_vm12 = vcmp.eq.s32.totalorder %v1775_v20, %v146_v47  ;;  %1269 = vmatprep.mubr.msk.bf16.mxu1 %vm257_vm4, %v1813_v45  ;;  %v189_v48 = vsel %vm173_vm11, 1.0, %v1589_v1 }
  0xe2   :  { %v188_v49 = vsel %vm172_vm12, 1.0, %v1589_v1 }
  0xe3   :  { %v1821_v50 = vpack.c.bf16 %v189_v48, %v188_v49  ;;  %v155_v51 = vpop.permute.xlu1 %154  ;;  %v1170_v49 = vunpack.c.l.bf16 %v1912_v41 }
  0xe4   :  { %v152_v52 = vpop.permute.xlu0 %151  ;;  %vm175_vm13 = vcmp.eq.s32.totalorder %v1775_v20, %v155_v51 }
  0xe5   :  { %vm174_vm14 = vcmp.eq.s32.totalorder %v1775_v20, %v152_v52  ;;  %v191_v53 = vsel %vm175_vm13, 1.0, %v1589_v1 }
  0xe6   :  { %v190_v54 = vsel %vm174_vm14, 1.0, %v1589_v1  ;;  %1270 = vmatmul.mubr.msk.bf16.gmra.mrb[8].mxu1 %vm257_vm4, %v1821_v50 }
  0xe7   :  { %v1829_v55 = vpack.c.bf16 %v191_v53, %v190_v54  ;;  %v161_v56 = vpop.permute.xlu1 %160  ;;  %v1166_v53 = vunpack.c.l.bf16 %v1920_v44 }
  0xe8   :  { %v158_v57 = vpop.permute.xlu0 %157  ;;  %vm177_vm15 = vcmp.eq.s32.totalorder %v1775_v20, %v161_v56  ;;  %v1171_v56 = vunpack.c.h.bf16 %v1912_v41 }
  0xe9   :  { %vm176_vm0 = vcmp.eq.s32.totalorder %v1775_v20, %v158_v57  ;;  %1273 = vmatprep.mubr.msk.bf16.mxu1 %vm257_vm4, %v1829_v55  ;;  %v193_v58 = vsel %vm177_vm15, 1.0, %v1589_v1  ;;  %v1897_v20 = vld [vmem:[%s2113_s3 + $0x10] sm:$0xff]  }
  0xea   :  { %v192_v59 = vsel %vm176_vm0, 1.0, %v1589_v1  ;;  %v1158_v27 = vunpack.c.l.bf16 %v1897_v20  ;;  %v1159_v34 = vunpack.c.h.bf16 %v1897_v20 }
  0xeb   :  { %v1837_v60 = vpack.c.bf16 %v193_v58, %v192_v59  ;;  %v1167_v59 = vunpack.c.h.bf16 %v1920_v44 }
  0xee   :  { %1274 = vmatmul.mubr.msk.bf16.gmra.mrb[12].mxu1 %vm257_vm4, %v1837_v60 }
  0xef   :  { %1293 = vmatprep.mubr.msk.bf16.mxu1 %vm1590_vm1, %v1589_v1 }
 0x1a9   :  { %v1263_v10 = vpop.f32.mrb[0].mxu1 }
 0x1aa   :  { %v325_v12 = vadd.f32 %v1263_v10, %v1154_v6  ;;  %v316_v13 = vpop.f32.mrb[1].mxu1 }
 0x1ab   :  { %v317_v14 = vadd.f32 %v1150_v7, %v316_v13  ;;  %v1264_v15 = vpop.f32.mrb[2].mxu1 }
 0x1ac   :  { %v328_v17 = vadd.f32 %v1264_v15, %v1155_v9  ;;  %v319_v18 = vpop.f32.mrb[3].mxu1  ;;  %v381_v22 = vmax.f32 %v325_v12, 0.0  ;;  %v1944_v12 = vld [vmem:[%s2113_s3 + $0x30] sm:$0xff]  }
 0x1ad   :  { %v320_v21 = vadd.f32 %v1151_v11, %v319_v18  ;;  %v379_v25 = vmax.f32 %v317_v14, 0.0 }
 0x1ae   :  { %v382_v23 = vmax.f32 %v328_v17, 0.0  ;;  %v1178_v17 = vunpack.c.l.bf16 %v1936_v2 }
 0x1af   :  { %v380_v26 = vmax.f32 %v320_v21, 0.0 }
 0x1b0   :  { %v396_v28 = vpack.c.bf16 %v382_v23, %v381_v22  ;;  %v1174_v22 = vunpack.c.l.bf16 %v1944_v12 }
 0x1b1   :  { %v395_v32 = vpack.c.bf16 %v380_v26, %v379_v25  ;;  %v1267_v33 = vpop.f32.mrb[4].mxu1  ;;  %v1179_v25 = vunpack.c.h.bf16 %v1936_v2  ;;  %v1453_v2 = vld [vmem:[#allocation8 + $0x30] sm:$0xff]  }
 0x1b2   :  { %v341_v36 = vadd.f32 %v1267_v33, %v1162_v24  ;;  %v332_v37 = vpop.f32.mrb[5].mxu1 }
 0x1b3   :  { %v333_v38 = vadd.f32 %v1158_v27, %v332_v37  ;;  %v1268_v39 = vpop.f32.mrb[6].mxu1  ;;  %1278 = vmatpush3.bf16.msra.mxu1 %v395_v32  ;;  %v1175_v32 = vunpack.c.h.bf16 %v1944_v12  ;;  %v1454_v12 = vld [vmem:[#allocation8 + $0x38] sm:$0xff]  }
 0x1b4   :  { %v344_v42 = vadd.f32 %v1268_v39, %v1163_v31  ;;  %v335_v43 = vpop.f32.mrb[7].mxu1  ;;  %1279 = vmatprep.subr.bf16.mxu1 %v1589_v1  ;;  %v385_v47 = vmax.f32 %v341_v36, 0.0 }
 0x1b5   :  { %v336_v46 = vadd.f32 %v1159_v34, %v335_v43  ;;  %v383_v51 = vmax.f32 %v333_v38, 0.0  ;;  %v203_v43 = vshrl.u32 %v96_v19, 7  ;;  %v1458_v19 = vld [vmem:[#allocation9 + $0x18] sm:$0xff]  }
 0x1b6   :  { %v386_v48 = vmax.f32 %v344_v42, 0.0 }
 0x1b7   :  { %v384_v52 = vmax.f32 %v336_v46, 0.0  ;;  %1280 = vmatpush3.bf16.msra.mxu1 %v396_v28 }
 0x1b8   :  { %v398_v54 = vpack.c.bf16 %v386_v48, %v385_v47  ;;  %1281 = vmatprep.subr.bf16.mxu1 %v1589_v1 }
 0x1b9   :  { %v397_v57 = vpack.c.bf16 %v384_v52, %v383_v51  ;;  %v1271_v58 = vpop.f32.mrb[8].mxu1 }
 0x1ba   :  { %v357_v61 = vadd.f32 %v1271_v58, %v1170_v49  ;;  %v348_v62 = vpop.f32.mrb[9].mxu1 }
 0x1bb   :  { %v349_v63 = vadd.f32 %v1166_v53, %v348_v62  ;;  %v1272_v0 = vpop.f32.mrb[10].mxu1  ;;  %1282 = vmatpush3.bf16.msra.mxu1 %v397_v57  ;;  %v204_v57 = vadd.s32 8, %v203_v43  ;;  %v1591_v62 = vmov 1.0|1.0  }
 0x1bc   :  { %v360_v3 = vadd.f32 %v1272_v0, %v1171_v56  ;;  %v351_v10 = vpop.f32.mrb[11].mxu1  ;;  %1283 = vmatprep.subr.bf16.mxu1 %v1589_v1  ;;  %v389_v14 = vmax.f32 %v357_v61, 0.0  ;;  %v1090_v61 = vld [vmem:[#allocation3] ss:$0 sm:$0xff]  ;;  %v1438_v0 = vld [vmem:[%s2114_s4 + $0x38] sm:$0xff]  }
 0x1bd   :  { %v352_v13 = vadd.f32 %v1167_v59, %v351_v10  ;;  %v387_v18 = vmax.f32 %v349_v63, 0.0  ;;  %vm210_vm2 = vcmp.eq.s32.totalorder %v203_v43, %v1090_v61  ;;  %vm211_vm3 = vcmp.eq.s32.totalorder %v204_v57, %v1090_v61  ;;  %v1437_v63 = vld [vmem:[%s2114_s4 + $0x30] sm:$0xff]   ;;  %v1446_v43 = vld [vmem:[#allocation6 + $0x38] sm:$0xff]   ;;  %v1111_v61 = vld [vmem:[%s2117_s7] ss:$0 sm:$0xff] }
 0x1be   :  { %v390_v15 = vmax.f32 %v360_v3, 0.0  ;;  %vm1965_vm5 = vmpackc.low %vm211_vm3, %vm210_vm2  ;;  %1310 = vmatpush3.bf16.msra.mxu0 %v1437_v63  ;;  %v1439_v3 = vld [vmem:[#allocation6] sm:$0xff]   ;;  %v1440_v10 = vld [vmem:[#allocation6 + $0x8] sm:$0xff]  }
 0x1bf   :  { %v388_v21 = vmax.f32 %v352_v13, 0.0  ;;  %1284 = vmatpush3.bf16.msra.mxu1 %v398_v54  ;;  %1311 = vmatprep.subr.bf16.mxu0 %v1589_v1  ;;  %v1441_v13 = vld [vmem:[#allocation6 + $0x10] sm:$0xff]  }
 0x1c0   :  { %v400_v23 = vpack.c.bf16 %v390_v15, %v389_v14  ;;  %1285 = vmatprep.subr.bf16.mxu1 %v1589_v1  ;;  %v1442_v14 = vld [vmem:[#allocation6 + $0x18] sm:$0xff]   ;;  %v1443_v15 = vld [vmem:[#allocation6 + $0x20] sm:$0xff]  }
 0x1c1   :  { %v399_v26 = vpack.c.bf16 %v388_v21, %v387_v18  ;;  %v1275_v28 = vpop.f32.mrb[12].mxu1  ;;  %v1444_v18 = vld [vmem:[#allocation6 + $0x28] sm:$0xff]   ;;  %v249_v21 = vunpack.c.l.bf16 %v1739_v8 }
 0x1c2   :  { %v373_v33 = vadd.f32 %v1275_v28, %v1178_v17  ;;  %v364_v36 = vpop.f32.mrb[13].mxu1  ;;  %1312 = vmatpush3.bf16.msra.mxu0 %v1438_v0 }
 0x1c3   :  { %v365_v37 = vadd.f32 %v1174_v22, %v364_v36  ;;  %v1276_v38 = vpop.f32.mrb[14].mxu1  ;;  %1286 = vmatpush3.bf16.msra.mxu1 %v399_v26 }
 0x1c4   :  { %v376_v39 = vadd.f32 %v1276_v38, %v1179_v25  ;;  %v367_v42 = vpop.f32.mrb[15].mxu1  ;;  %1287 = vmatprep.subr.bf16.mxu1 %v1589_v1  ;;  %v393_v47 = vmax.f32 %v373_v33, 0.0 }
 0x1c5   :  { %v368_v46 = vadd.f32 %v1175_v32, %v367_v42  ;;  %v391_v51 = vmax.f32 %v365_v37, 0.0  ;;  %v1445_v42 = vld [vmem:[#allocation6 + $0x30] sm:$0xff]  }
 0x1c6   :  { %v394_v48 = vmax.f32 %v376_v39, 0.0 }
 0x1c7   :  { %v392_v52 = vmax.f32 %v368_v46, 0.0  ;;  %1288 = vmatpush3.bf16.msra.mxu1 %v400_v23  ;;  %v250_v23 = vunpack.c.h.bf16 %v1739_v8  ;;  %v1102_v8 = vld [vmem:[%s2115_s5] ss:$0 sm:$0xff] }
 0x1c8   :  { %v402_v54 = vpack.c.bf16 %v394_v48, %v393_v47  ;;  %1289 = vmatprep.subr.bf16.mxu1 %v1589_v1 }
 0x1c9   :  { %v401_v58 = vpack.c.bf16 %v392_v52, %v391_v51 }
 0x1cb   :  { %1290 = vmatpush3.bf16.msra.mxu1 %v401_v58 }
 0x1cc   :  { %1291 = vmatprep.subr.bf16.mxu1 %v1589_v1 }
 0x1cf   :  { %1292 = vmatpush3.bf16.msra.mxu1 %v402_v54 }
 0x1d0   :  { %1317 = vmatprep.subr.bf16.mxu1 %v1589_v1 }
 0x1d2   :  { %1294 = vmatmul.mubr.msk.bf16.vlgmr.msra.gmra.mrb[16].mxu1 %vm1965_vm5, %v1591_v62 }
 0x1d3   :  { %1333 = vmatprep.mubr.msk.bf16.mxu1 %vm1590_vm1, %v1589_v1  ;;  %1318 = vmatpush3.bf16.msra.mxu1 %v1439_v3 }
 0x1d4   :  { %1319 = vmatprep.subr.bf16.mxu1 %v1589_v1 }
 0x1d7   :  { %1320 = vmatpush3.bf16.msra.mxu1 %v1440_v10 }
 0x1d8   :  { %1321 = vmatprep.subr.bf16.mxu1 %v1589_v1 }
 0x1db   :  { %1322 = vmatpush3.bf16.msra.mxu1 %v1441_v13 }
 0x1dc   :  { %1323 = vmatprep.subr.bf16.mxu1 %v1589_v1 }
 0x1df   :  { %1324 = vmatpush3.bf16.msra.mxu1 %v1442_v14 }
 0x1e0   :  { %1325 = vmatprep.subr.bf16.mxu1 %v1589_v1 }
 0x1e3   :  { %1326 = vmatpush3.bf16.msra.mxu1 %v1443_v15 }
 0x1e4   :  { %1327 = vmatprep.subr.bf16.mxu1 %v1589_v1 }
 0x1e7   :  { %1328 = vmatpush3.bf16.msra.mxu1 %v1444_v18 }
 0x1e8   :  { %1329 = vmatprep.subr.bf16.mxu1 %v1589_v1 }
 0x1eb   :  { %1330 = vmatpush3.bf16.msra.mxu1 %v1445_v42 }
 0x1ec   :  { %1331 = vmatprep.subr.bf16.mxu1 %v1589_v1 }
 0x1ef   :  { %1332 = vmatpush3.bf16.msra.mxu1 %v1446_v43 }
 0x1f0   :  { %1375 = vmatprep.subr.bf16.mxu1 %v1589_v1 }
 0x2a5   :  { %v437_v26 = vpop.f32.mrb[16].mxu1 }
 0x2a6   :  { %v1295_v28 = vpop.f32.mrb[17].mxu1  ;;  %v438_v36 = vadd.f32 %v437_v26, %v249_v21 }
 0x2a7   :  { %v440_v33 = vpop.f32.mrb[18].mxu1 }
 0x2a8   :  { %v441_v37 = vadd.f32 %v440_v33, %v250_v23  ;;  %v1296_v38 = vpop.f32.mrb[19].mxu1 }
 0x2aa   :  { %v444_v39 = vpack.c.bf16 %v441_v37, %v438_v36 }
 0x2ac   :  { %1314 = vmatmul.mubr.bf16.vlgmr.msra.gmra.mrb[0].mxu0 %v444_v39 }
 0x2ad   :  { %1339 = vmatprep.mubr.msk.bf16.mxu0 %vm257_vm4, %v1787_v30 }
 0x37f   :  { %v550_v46 = vpop.f32.mrb[0].mxu0 }
 0x380   :  { %v551_v47 = vadd.f32 %v1102_v8, %v550_v46  ;;  %v1315_v48 = vpop.f32.mrb[1].mxu0 }
 0x381   :  { %v553_v51 = vpop.f32.mrb[2].mxu0 }
 0x382   :  { %v554_v52 = vadd.f32 %v1102_v8, %v553_v51  ;;  %v1316_v54 = vpop.f32.mrb[3].mxu0  ;;  %v557_v57 = vmax.f32 %v551_v47, 0.0 }
 0x384   :  { %v558_v30 = vmax.f32 %v554_v52, 0.0 }
 0x386   :  { %v559_v58 = vpack.c.bf16 %v558_v30, %v557_v57 }
 0x388   :  { %1334 = vmatmul.mubr.bf16.vlgmr.msra.gmra.mrb[20].mxu1 %v559_v58 }
 0x389   :  { %1391 = vmatprep.mubr.msk.bf16.mxu1 %vm1590_vm1, %v1589_v1 }
 0x45b   :  { %v665_v63 = vpop.f32.mrb[20].mxu1 }
 0x45c   :  { %v2002_v0 = vadd.f32 %v1111_v61, %v665_v63  ;;  %v1335_v3 = vpop.f32.mrb[21].mxu1 }
 0x45d   :  { %v668_v10 = vpop.f32.mrb[22].mxu1 }
 0x45e   :  { %v2004_v13 = vadd.f32 %v1111_v61, %v668_v10  ;;  %v1336_v14 = vpop.f32.mrb[23].mxu1  ;;  %v672_v15 = vmax.f32 %v2002_v0, 0.0 }
 0x460   :  { %v673_v18 = vmax.f32 %v2004_v13, 0.0 }
 0x462   :  { %v678_v21 = vpack.c.bf16 %v673_v18, %v672_v15 }
 0x464   :  { %1337 = vmatprep.subr.bf16.mxu0 %v678_v21 }
 0x465   :  { %1338 = vmatpush3.bf16.msra.mxu0 %v678_v21 }
 0x466   :  { %1355 = vmatprep.subr.bf16.mxu0 %v1589_v1 }
 0x468   :  { %1340 = vmatmul.mubr.msk.bf16.vlgmr.msra.gmra.mrb[4].mxu0 %vm257_vm4, %v1785_v29  ;;  %v1447_v29 = vld [vmem:[#allocation8] sm:$0xff]  }
 0x469   :  { %1343 = vmatprep.mubr.msk.bf16.mxu0 %vm257_vm4, %v1797_v35  ;;  %1376 = vmatpush3.bf16.msra.mxu1 %v1447_v29  ;;  %v1448_v35 = vld [vmem:[#allocation8 + $0x8] sm:$0xff]  }
 0x46a   :  { %1377 = vmatprep.subr.bf16.mxu1 %v1589_v1 }
 0x46d   :  { %1378 = vmatpush3.bf16.msra.mxu1 %v1448_v35 }
 0x46e   :  { %1379 = vmatprep.subr.bf16.mxu1 %v1589_v1 }
 0x470   :  { %1344 = vmatmul.mubr.msk.bf16.gmra.mrb[8].mxu0 %vm257_vm4, %v1805_v40  ;;  %v1449_v40 = vld [vmem:[#allocation8 + $0x10] sm:$0xff]  }
 0x471   :  { %1347 = vmatprep.mubr.msk.bf16.mxu0 %vm257_vm4, %v1813_v45  ;;  %1380 = vmatpush3.bf16.msra.mxu1 %v1449_v40  ;;  %v1450_v45 = vld [vmem:[#allocation8 + $0x18] sm:$0xff]  }
 0x472   :  { %1381 = vmatprep.subr.bf16.mxu1 %v1589_v1 }
 0x475   :  { %1382 = vmatpush3.bf16.msra.mxu1 %v1450_v45 }
 0x476   :  { %1383 = vmatprep.subr.bf16.mxu1 %v1589_v1 }
 0x478   :  { %1348 = vmatmul.mubr.msk.bf16.gmra.mrb[12].mxu0 %vm257_vm4, %v1821_v50  ;;  %v1451_v50 = vld [vmem:[#allocation8 + $0x20] sm:$0xff]  }
 0x479   :  { %1351 = vmatprep.mubr.msk.bf16.mxu0 %vm257_vm4, %v1829_v55  ;;  %1384 = vmatpush3.bf16.msra.mxu1 %v1451_v50  ;;  %v1452_v55 = vld [vmem:[#allocation8 + $0x28] sm:$0xff]  }
 0x47a   :  { %1385 = vmatprep.subr.bf16.mxu1 %v1589_v1 }
 0x47d   :  { %1386 = vmatpush3.bf16.msra.mxu1 %v1452_v55 }
 0x47e   :  { %1387 = vmatprep.subr.bf16.mxu1 %v1589_v1 }
 0x480   :  { %1352 = vmatmul.mubr.msk.bf16.gmra.mrb[16].mxu0 %vm257_vm4, %v1837_v60 }
 0x481   :  { %1371 = vmatprep.mubr.msk.bf16.mxu0 %vm1590_vm1, %v1589_v1  ;;  %1388 = vmatpush3.bf16.msra.mxu1 %v1453_v2 }
 0x482   :  { %1389 = vmatprep.subr.bf16.mxu1 %v1589_v1 }
 0x485   :  { %1390 = vmatpush3.bf16.msra.mxu1 %v1454_v12 }
 0x53b   :  { %v1341_v60 = vpop.f32.mrb[4].mxu0 }
 0x53c   :  { %v722_v23 = vadd.f32 %v1341_v60, %v1154_v6  ;;  %v713_v26 = vpop.f32.mrb[5].mxu0 }
 0x53d   :  { %v714_v28 = vadd.f32 %v1150_v7, %v713_v26  ;;  %v1342_v33 = vpop.f32.mrb[6].mxu0 }
 0x53e   :  { %v725_v36 = vadd.f32 %v1342_v33, %v1155_v9  ;;  %v716_v37 = vpop.f32.mrb[7].mxu0  ;;  %v778_v39 = vmax.f32 %v722_v23, 0.0  ;;  %v1460_v33 = vld [vmem:[#allocation9 + $0x28] sm:$0xff]  }
 0x53f   :  { %v717_v38 = vadd.f32 %v1151_v11, %v716_v37  ;;  %v776_v43 = vmax.f32 %v714_v28, 0.0  ;;  %v1457_v28 = vld [vmem:[#allocation9 + $0x10] sm:$0xff]  }
 0x540   :  { %v779_v42 = vmax.f32 %v725_v36, 0.0 }
 0x541   :  { %v777_v8 = vmax.f32 %v717_v38, 0.0 }
 0x542   :  { %v793_v46 = vpack.c.bf16 %v779_v42, %v778_v39 }
 0x543   :  { %v792_v47 = vpack.c.bf16 %v777_v8, %v776_v43  ;;  %v1345_v48 = vpop.f32.mrb[8].mxu0 }
 0x544   :  { %v738_v6 = vadd.f32 %v1345_v48, %v1162_v24  ;;  %v729_v51 = vpop.f32.mrb[9].mxu0  ;;  %v1130_v48 = vld [vmem:[%s2119_s9] ss:$0 sm:$0xff]  ;;  %s1552_s9 = scalar_lea.vmem %s1077_s19, 256 }
 0x545   :  { %v730_v7 = vadd.f32 %v1158_v27, %v729_v51  ;;  %v1346_v4 = vpop.f32.mrb[10].mxu0  ;;  %1356 = vmatpush3.bf16.msra.mxu0 %v792_v47  ;;  %v1462_v47 = vld [vmem:[#allocation9 + $0x38] sm:$0xff]   ;;  %p1553_p4 = scmp.ne.s32.totalorder %s1077_s19, %s1552_s9  ;;  %p1558_p6 = scmp.lt.s32.totalorder %s1552_s9, %s1552_s9 }
 0x546   :  { %v741_v5 = vadd.f32 %v1346_v4, %v1163_v31  ;;  %v732_v9 = vpop.f32.mrb[11].mxu0  ;;  %1357 = vmatprep.subr.bf16.mxu0 %v1589_v1  ;;  %v782_v52 = vmax.f32 %v738_v6, 0.0 }
 0x547   :  { %v733_v11 = vadd.f32 %v1159_v34, %v732_v9  ;;  %v780_v57 = vmax.f32 %v730_v7, 0.0  ;;  %p1559_p7 = por %p1558_p6, %p1557_p5 }
 0x548   :  { %v783_v54 = vmax.f32 %v741_v5, 0.0 }
 0x549   :  { %v781_v30 = vmax.f32 %v733_v11, 0.0  ;;  %1358 = vmatpush3.bf16.msra.mxu0 %v793_v46  ;;  %v1461_v46 = vld [vmem:[#allocation9 + $0x30] sm:$0xff]   ;;  %p1560_p8 = pnand %p1559_p7, %p1553_p4 }
 0x54a   :  { %v795_v24 = vpack.c.bf16 %v783_v54, %v782_v52  ;;  %1359 = vmatprep.subr.bf16.mxu0 %v1589_v1 }
 0x54b   :  { %v794_v27 = vpack.c.bf16 %v781_v30, %v780_v57  ;;  %v1349_v58 = vpop.f32.mrb[12].mxu0 }
 0x54c   :  { %v754_v16 = vadd.f32 %v1349_v58, %v1170_v49  ;;  %v745_v31 = vpop.f32.mrb[13].mxu0 }
 0x54d   :  { %v746_v61 = vadd.f32 %v1166_v53, %v745_v31  ;;  %v1350_v63 = vpop.f32.mrb[14].mxu0  ;;  %1360 = vmatpush3.bf16.msra.mxu0 %v794_v27 }
 0x54e   :  { %v757_v20 = vadd.f32 %v1350_v63, %v1171_v56  ;;  %v748_v34 = vpop.f32.mrb[15].mxu0  ;;  %1361 = vmatprep.subr.bf16.mxu0 %v1589_v1  ;;  %v786_v10 = vmax.f32 %v754_v16, 0.0 }
 0x54f   :  { %v749_v3 = vadd.f32 %v1167_v59, %v748_v34  ;;  %v784_v21 = vmax.f32 %v746_v61, 0.0 }
 0x550   :  { %v787_v14 = vmax.f32 %v757_v20, 0.0 }
 0x551   :  { %v785_v29 = vmax.f32 %v749_v3, 0.0  ;;  %1362 = vmatpush3.bf16.msra.mxu0 %v795_v24 }
 0x552   :  { %v797_v49 = vpack.c.bf16 %v787_v14, %v786_v10  ;;  %1363 = vmatprep.subr.bf16.mxu0 %v1589_v1 }
 0x553   :  { %v796_v53 = vpack.c.bf16 %v785_v29, %v784_v21  ;;  %v1353_v35 = vpop.f32.mrb[16].mxu0 }
 0x554   :  { %v770_v41 = vadd.f32 %v1353_v35, %v1178_v17  ;;  %v761_v56 = vpop.f32.mrb[17].mxu0 }
 0x555   :  { %v762_v40 = vadd.f32 %v1174_v22, %v761_v56  ;;  %v1354_v45 = vpop.f32.mrb[18].mxu0  ;;  %1364 = vmatpush3.bf16.msra.mxu0 %v796_v53 }
 0x556   :  { %v773_v44 = vadd.f32 %v1354_v45, %v1179_v25  ;;  %v764_v59 = vpop.f32.mrb[19].mxu0  ;;  %1365 = vmatprep.subr.bf16.mxu0 %v1589_v1  ;;  %v790_v55 = vmax.f32 %v770_v41, 0.0  ;;  %v1455_v25 = vld [vmem:[#allocation9] sm:$0xff]  }
 0x557   :  { %v765_v50 = vadd.f32 %v1175_v32, %v764_v59  ;;  %v788_v23 = vmax.f32 %v762_v40, 0.0  ;;  %v1456_v32 = vld [vmem:[#allocation9 + $0x8] sm:$0xff]  }
 0x558   :  { %v791_v60 = vmax.f32 %v773_v44, 0.0 }
 0x559   :  { %v789_v26 = vmax.f32 %v765_v50, 0.0  ;;  %1366 = vmatpush3.bf16.msra.mxu0 %v797_v49 }
 0x55a   :  { %v799_v17 = vpack.c.bf16 %v791_v60, %v790_v55  ;;  %1367 = vmatprep.subr.bf16.mxu0 %v1589_v1 }
 0x55b   :  { %v798_v22 = vpack.c.bf16 %v789_v26, %v788_v23 }
 0x55d   :  { %1368 = vmatpush3.bf16.msra.mxu0 %v798_v22 }
 0x55e   :  { %1369 = vmatprep.subr.bf16.mxu0 %v1589_v1 }
 0x561   :  { %1370 = vmatpush3.bf16.msra.mxu0 %v799_v17 }
 0x562   :  { %1395 = vmatprep.subr.bf16.mxu0 %v1589_v1 }
 0x564   :  { %1372 = vmatmul.mubr.msk.bf16.vlgmr.msra.gmra.mrb[20].mxu0 %vm1965_vm5, %v1591_v62  ;;  %v1459_v62 = vld [vmem:[#allocation9 + $0x20] sm:$0xff]  }
 0x565   :  { %1411 = vmatprep.mubr.msk.bf16.mxu0 %vm1590_vm1, %v1589_v1  ;;  %1396 = vmatpush3.bf16.msra.mxu0 %v1455_v25 }
 0x566   :  { %1397 = vmatprep.subr.bf16.mxu0 %v1589_v1 }
 0x569   :  { %1398 = vmatpush3.bf16.msra.mxu0 %v1456_v32 }
 0x56a   :  { %1399 = vmatprep.subr.bf16.mxu0 %v1589_v1 }
 0x56d   :  { %1400 = vmatpush3.bf16.msra.mxu0 %v1457_v28 }
 0x56e   :  { %1401 = vmatprep.subr.bf16.mxu0 %v1589_v1 }
 0x571   :  { %1402 = vmatpush3.bf16.msra.mxu0 %v1458_v19 }
 0x572   :  { %1403 = vmatprep.subr.bf16.mxu0 %v1589_v1 }
 0x575   :  { %1404 = vmatpush3.bf16.msra.mxu0 %v1459_v62 }
 0x576   :  { %1405 = vmatprep.subr.bf16.mxu0 %v1589_v1 }
 0x579   :  { %1406 = vmatpush3.bf16.msra.mxu0 %v1460_v33 }
 0x57a   :  { %1407 = vmatprep.subr.bf16.mxu0 %v1589_v1 }
 0x57d   :  { %1408 = vmatpush3.bf16.msra.mxu0 %v1461_v46 }
 0x57e   :  { %1409 = vmatprep.subr.bf16.mxu0 %v1589_v1  ;;  %v1139_v1 = vld [vmem:[%s2121_s11] ss:$0 sm:$0xff] }
 0x581   :  { %1410 = vmatpush3.bf16.msra.mxu0 %v1462_v47 }
 0x637   :  { %v834_v36 = vpop.f32.mrb[20].mxu0 }
 0x638   :  { %v1373_v37 = vpop.f32.mrb[21].mxu0  ;;  %v835_v39 = vadd.f32 %v834_v36, %v672_v15 }
 0x639   :  { %v837_v38 = vpop.f32.mrb[22].mxu0 }
 0x63a   :  { %v838_v42 = vadd.f32 %v837_v38, %v673_v18  ;;  %v1374_v43 = vpop.f32.mrb[23].mxu0 }
 0x63c   :  { %v841_v8 = vpack.c.bf16 %v838_v42, %v835_v39 }
 0x63e   :  { %1392 = vmatmul.mubr.bf16.vlgmr.msra.gmra.mrb[24].mxu1 %v841_v8 }
 0x711   :  { %v947_v6 = vpop.f32.mrb[24].mxu1 }
 0x712   :  { %v948_v51 = vadd.f32 %v1130_v48, %v947_v6  ;;  %v1393_v0 = vpop.f32.mrb[25].mxu1 }
 0x713   :  { %v950_v15 = vpop.f32.mrb[26].mxu1 }
 0x714   :  { %v951_v7 = vadd.f32 %v1130_v48, %v950_v15  ;;  %v1394_v13 = vpop.f32.mrb[27].mxu1  ;;  %v954_v18 = vmax.f32 %v948_v51, 0.0 }
 0x716   :  { %v955_v4 = vmax.f32 %v951_v7, 0.0 }
 0x718   :  { %v956_v5 = vpack.c.bf16 %v955_v4, %v954_v18 }
 0x71a   :  { %1412 = vmatmul.mubr.bf16.vlgmr.msra.gmra.mrb[24].mxu0 %v956_v5 }
 0x7ed   :  { %v1062_v9 = vpop.f32.mrb[24].mxu0 }
 0x7ee   :  { %v1063_v11 = vadd.f32 %v1139_v1, %v1062_v9  ;;  %v1413_v52 = vpop.f32.mrb[25].mxu0 }
 0x7ef   :  { %v1065_v54 = vpop.f32.mrb[26].mxu0 }
 0x7f0   :  { %1069 = vst [vmem:[#allocation11] sm:$0xff] %v1063_v11  ;;  %v1066_v57 = vadd.f32 %v1139_v1, %v1065_v54  ;;  %v1414_v30 = vpop.f32.mrb[27].mxu0 }
 0x7f2   :  { %1070 = vst [vmem:[#allocation11 + $0x8] sm:$0xff] %v1066_v57 }
 0x7f3   :  { %1563 = shalt.err (!%p1560_p8)
}
 0x7f4   :  { %s1564_s23 = scalar_lea.hbm %s2122_s12, 256 }
 0x7f5   :  { %p1565_p9 = scmp.ne.s32.totalorder %s2122_s12, %s1564_s23  ;;  %p1568_p10 = scmp.lt.u32.totalorder %s1564_s23, %s2122_s12 }
 0x7f7   :  { %p1570_p11 = pnand %p1568_p10, %p1565_p9 }
 0x7f9   :  { %1573 = shalt.err (!%p1570_p11)
}
 0x7fa   :  { %s1593_s25 = smov 128   ;;  %s1594_s1 = smov 8  }
 0x7fb   :  { %1082 = dma.vmem_to_hbm [thread:$0]  %s1077_s19, 256, %s2122_s12, [#allocation5], %s1593_s25, %s1593_s25, %s1594_s1  }
 0x7fc   :  { %1580 = dma.done.wait [#allocation5], 256  }
 0x7fd   :  { %1581 = vsyncadd [#allocation5], 4294967040 }
 0x7fe   :  { %1086 = vsyncpa [#allocation4], 1 }
 0x7ff   :  { %1087 = vsyncpa [#allocation7], 1 }
 0x800   :  { %1088 = vsyncpa [#allocation10], 1 }
 0x801   :  { %1089 = vsyncpa [#allocation5], 1 }

</bundles_post_ra>
